<compile_context>
chip_gen: v6e
topology: v6e:2x2x1
jax: 0.10.0
libtpu: 0.0.40
codegen_flags: <defaults>
</compile_context>

<pallas_src>
import functools

import jax
import jax.numpy as jnp
from jax.experimental import pallas as pl
from jax.experimental.pallas import tpu as pltpu


def _round_up(x, m):
    return ((x + m - 1) // m) * m


def _resident_spec(shape):
    """BlockSpec for a grid-invariant operand (weights/bias): single-buffered."""
    try:
        return pl.BlockSpec(shape, lambda i: (0, 0), pipeline_mode=pl.Buffered(1))
    except (AttributeError, TypeError):
        # Older JAX without pipeline_mode: fall back to default double-buffering.
        return pl.BlockSpec(shape, lambda i: (0, 0))


def _fused_mlp_kernel(*refs):
    """refs = (x_ref, w0_ref, b0_ref, w1_ref, b1_ref, ..., o_ref).

    One batch tile: chains all Linear(+bias)+ReLU layers fully in VMEM.
    """
    x_ref, o_ref = refs[0], refs[-1]
    layer_refs = refs[1:-1]
    n_layers = len(layer_refs) // 2
    compute_dtype = layer_refs[0].dtype

    h = x_ref[...].astype(compute_dtype)                 # cast in-kernel (no HBM pass)
    for l in range(n_layers):
        w_ref = layer_refs[2 * l]
        b_ref = layer_refs[2 * l + 1]
        # MXU matmul with f32 accumulation.
        y = jnp.dot(h, w_ref[...], preferred_element_type=jnp.float32)
        # Bias add + ReLU in f32 on the VPU.
        y = jnp.maximum(y + b_ref[...], 0.0)
        h = y if l == n_layers - 1 else y.astype(compute_dtype)
    o_ref[...] = h.astype(o_ref.dtype)


@functools.partial(jax.jit, static_argnames=("out_dtype", "tm_max"))
def _fc_body_forward(x, params, *, out_dtype, tm_max):
    """x: (B, state_dim). params: tuple of (w, b) per layer (logical shapes)."""
    B, din = x.shape
    compute_dtype = params[0][0].dtype
    widths = [w.shape[1] for (w, _) in params]
    d_out = widths[-1]

    x_bytes = jnp.dtype(x.dtype).itemsize
    c_bytes = jnp.dtype(compute_dtype).itemsize
    o_bytes = jnp.dtype(out_dtype).itemsize

    # Dtype-aware sublane packing (bf16 packs 16 rows / vreg, int8/fp8 -> 32).
    sub = {1: 32, 2: 16, 4: 8}.get(min(c_bytes, o_bytes), 8)

    # ---- VMEM-budget-derived batch tile -------------------------------------
    # Per-row bytes: double-buffered x + out tiles, plus live intermediates
    # (f32 pre-activation + compute-dtype copy per layer; overestimate is fine).
    per_row = 2 * din * x_bytes + 2 * d_out * o_bytes
    per_row += sum(w * (4 + c_bytes) for w in widths)
    act_budget = 16 * 1024 * 1024
    tm_cap = max(sub, min(tm_max, (act_budget // max(per_row, 1)) // sub * sub))

    b_ceil = _round_up(max(B, sub), sub)
    n_steps = pl.cdiv(b_ceil, tm_cap)
    if n_steps == 1 and b_ceil >= 2 * sub:
        n_steps = 2                      # >=2 grid steps -> both v7x TensorCores work
    tm = _round_up(pl.cdiv(b_ceil, n_steps), sub)
    b_total = tm * n_steps               # waste is at most a few sublane groups

    if b_total != B:
        x = jnp.pad(x, ((0, b_total - B), (0, 0)))

    # ---- specs ---------------------------------------------------------------
    in_specs = [pl.BlockSpec((tm, din), lambda i: (i, 0))]      # batch-tiled x
    flat_inputs = [x]
    for w, b in params:
        in_specs.append(_resident_spec(w.shape))                # resident weight
        in_specs.append(_resident_spec(b.shape))                # resident bias
        flat_inputs += [w, b]

    weight_bytes = sum(w.size * w.dtype.itemsize + b.size * b.dtype.itemsize
                       for (w, b) in params)
    footprint = weight_bytes + per_row * tm
    vmem_limit = int(min(64 * 1024 * 1024,
                         max(2 * footprint + (2 << 20), 8 * 1024 * 1024)))

    out = pl.pallas_call(
        _fused_mlp_kernel,
        out_shape=jax.ShapeDtypeStruct((b_total, d_out), out_dtype),
        grid=(n_steps,),
        in_specs=in_specs,
        out_specs=pl.BlockSpec((tm, d_out), lambda i: (i, 0)),
        compiler_params=pltpu.CompilerParams(
            dimension_semantics=("parallel",),
            vmem_limit_bytes=vmem_limit),
    )(*flat_inputs)

    # Only padded batch rows need slicing off (output width is already logical).
    return out if b_total == B else out[:B]


class FCBodyPallas:
    """JAX/Pallas equivalent of FCBody(state_dim, hidden_units, gate=relu)."""

    TM_MAX = 2048   # upper bound on the batch tile; actual tile is VMEM-budget derived

    def __init__(self, state_dim, hidden_units=(64, 64), key=None,
                 compute_dtype=jnp.bfloat16, out_dtype=None):
        if key is None:
            key = jax.random.PRNGKey(0)
        dims = (state_dim,) + tuple(hidden_units)
        self.feature_dim = dims[-1]
        self.compute_dtype = compute_dtype
        # Output dtype defaults to the compute dtype (halves writeback bytes).
        # Pass out_dtype=jnp.float32 (and compute_dtype=jnp.float32) for exact
        # f32 PyTorch semantics.
        self.out_dtype = compute_dtype if out_dtype is None else out_dtype
        params = []
        for din, dout in zip(dims[:-1], dims[1:]):
            key, wk = jax.random.split(key)
            # Deterministic synthetic init.
            # TODO(synk): original layer_init uses orthogonal init; forward math unchanged.
            w = jax.random.normal(wk, (din, dout), jnp.float32) / jnp.sqrt(float(din))
            b = jnp.zeros((1, dout), jnp.float32)
            params.append((w.astype(compute_dtype), b))          # logical shapes, no padding
        self.params = tuple(params)

    def __call__(self, x):
        return _fc_body_forward(x, self.params, out_dtype=self.out_dtype,
                                tm_max=self.TM_MAX)

    def reference(self, x):
        """Pure-JAX reference of the same mixed-precision math."""
        h = x.astype(self.compute_dtype)
        n = len(self.params)
        for l, (w, b) in enumerate(self.params):
            y = jnp.maximum(
                jnp.dot(h, w, preferred_element_type=jnp.float32) + b, 0.0)
            h = y if l == n - 1 else y.astype(self.compute_dtype)
        return h.astype(self.out_dtype)


if __name__ == "__main__":
    key = jax.random.PRNGKey(0)
    k_in, k_model = jax.random.split(key)

    batch, state_dim = 8, 16
    hidden_units = (64, 64)

    x = jax.random.normal(k_in, (batch, state_dim), jnp.float32)

    body = FCBodyPallas(state_dim, hidden_units, key=k_model)
    out = jax.block_until_ready(body(x))

    assert out.shape == (batch, hidden_units[-1])
    ref = body.reference(x)
    err = float(jnp.max(jnp.abs(out.astype(jnp.float32) - ref.astype(jnp.float32))))
    assert jnp.allclose(out.astype(jnp.float32), ref.astype(jnp.float32),
                        atol=2e-2, rtol=2e-2), err

    print("KERNEL_OK")
</pallas_src>

<mosaic_0001>
module attributes {stable_mosaic.version = 11 : i64} {
  func.func @_fused_mlp_kernel(%arg0: i32, %arg1: memref<16x16xf32, #tpu.memory_space<vmem>>, %arg2: memref<16x64xbf16, #tpu.memory_space<vmem>>, %arg3: memref<1x64xf32, #tpu.memory_space<vmem>>, %arg4: memref<64x64xbf16, #tpu.memory_space<vmem>>, %arg5: memref<1x64xf32, #tpu.memory_space<vmem>>, %arg6: memref<16x64xbf16, #tpu.memory_space<vmem>>) attributes {dimension_semantics = [#tpu.dimension_semantics<parallel>], iteration_bounds = array<i64: 1>, scalar_prefetch = 0 : i64, scratch_operands = 0 : i64, tpu.core_type = #tpu.core_type<tc>, window_params = [{transform_indices = @transform_0, window_bounds = array<i64: 16, 16>}, {pipeline_mode = #tpu.pipeline_mode<synchronous>, transform_indices = @transform_1, window_bounds = array<i64: 16, 64>}, {pipeline_mode = #tpu.pipeline_mode<synchronous>, transform_indices = @transform_2, window_bounds = array<i64: 1, 64>}, {pipeline_mode = #tpu.pipeline_mode<synchronous>, transform_indices = @transform_3, window_bounds = array<i64: 64, 64>}, {pipeline_mode = #tpu.pipeline_mode<synchronous>, transform_indices = @transform_4, window_bounds = array<i64: 1, 64>}, {transform_indices = @transform_5, window_bounds = array<i64: 16, 64>}]} {
    %c0 = arith.constant 0 : index
    %c0_0 = arith.constant 0 : index
    %0 = vector.load %arg1[%c0, %c0_0] : memref<16x16xf32, #tpu.memory_space<vmem>>, vector<16x16xf32>
    %1 = arith.truncf %0 : vector<16x16xf32> to vector<16x16xbf16>
    %c0_1 = arith.constant 0 : index
    %c0_2 = arith.constant 0 : index
    %2 = vector.load %arg2[%c0_1, %c0_2] : memref<16x64xbf16, #tpu.memory_space<vmem>>, vector<16x64xbf16>
    %cst = arith.constant dense<0.000000e+00> : vector<16x64xf32>
    %3 = tpu.matmul %1, %2, %cst {dimension_numbers = #tpu.dot_dimension_numbers<[1], [0], [0], [1], [0, 0, 1, 1], [], []>} : vector<16x16xbf16>, vector<16x64xbf16>, vector<16x64xf32> -> vector<16x64xf32>
    %c0_3 = arith.constant 0 : index
    %c0_4 = arith.constant 0 : index
    %4 = vector.load %arg3[%c0_3, %c0_4] : memref<1x64xf32, #tpu.memory_space<vmem>>, vector<1x64xf32>
    %5 = vector.broadcast %4 : vector<1x64xf32> to vector<16x64xf32>
    %6 = arith.addf %3, %5 : vector<16x64xf32>
    %cst_5 = arith.constant 0.000000e+00 : f32
    %7 = vector.broadcast %cst_5 : f32 to vector<16x64xf32>
    %8 = arith.maximumf %6, %7 : vector<16x64xf32>
    %9 = arith.truncf %8 : vector<16x64xf32> to vector<16x64xbf16>
    %c0_6 = arith.constant 0 : index
    %c0_7 = arith.constant 0 : index
    %10 = vector.load %arg4[%c0_6, %c0_7] : memref<64x64xbf16, #tpu.memory_space<vmem>>, vector<64x64xbf16>
    %cst_8 = arith.constant dense<0.000000e+00> : vector<16x64xf32>
    %11 = tpu.matmul %9, %10, %cst_8 {dimension_numbers = #tpu.dot_dimension_numbers<[1], [0], [0], [1], [0, 0, 1, 1], [], []>} : vector<16x64xbf16>, vector<64x64xbf16>, vector<16x64xf32> -> vector<16x64xf32>
    %c0_9 = arith.constant 0 : index
    %c0_10 = arith.constant 0 : index
    %12 = vector.load %arg5[%c0_9, %c0_10] : memref<1x64xf32, #tpu.memory_space<vmem>>, vector<1x64xf32>
    %13 = vector.broadcast %12 : vector<1x64xf32> to vector<16x64xf32>
    %14 = arith.addf %11, %13 : vector<16x64xf32>
    %cst_11 = arith.constant 0.000000e+00 : f32
    %15 = vector.broadcast %cst_11 : f32 to vector<16x64xf32>
    %16 = arith.maximumf %14, %15 : vector<16x64xf32>
    %17 = arith.truncf %16 : vector<16x64xf32> to vector<16x64xbf16>
    %c0_12 = arith.constant 0 : index
    %c0_13 = arith.constant 0 : index
    %18 = vector.load %arg6[%c0_12, %c0_13] : memref<16x64xbf16, #tpu.memory_space<vmem>>, vector<16x64xbf16>
    tpu.vector_store %arg6[%c0_12, %c0_13], %17 {strides = array<i32>} : memref<16x64xbf16, #tpu.memory_space<vmem>>, vector<16x64xbf16>,
    return
  }
  func.func @transform_0(%arg0: i32) -> (i32, i32) {
    %c0_i32 = arith.constant 0 : i32
    %c0_i32_0 = arith.constant 0 : i32
    return %arg0, %c0_i32 : i32, i32
  }
  func.func @transform_1(%arg0: i32) -> (i32, i32) {
    %c0_i32 = arith.constant 0 : i32
    %c0_i32_0 = arith.constant 0 : i32
    %c0_i32_1 = arith.constant 0 : i32
    return %c0_i32, %c0_i32_0 : i32, i32
  }
  func.func @transform_2(%arg0: i32) -> (i32, i32) {
    %c0_i32 = arith.constant 0 : i32
    %c0_i32_0 = arith.constant 0 : i32
    %c0_i32_1 = arith.constant 0 : i32
    return %c0_i32, %c0_i32_0 : i32, i32
  }
  func.func @transform_3(%arg0: i32) -> (i32, i32) {
    %c0_i32 = arith.constant 0 : i32
    %c0_i32_0 = arith.constant 0 : i32
    %c0_i32_1 = arith.constant 0 : i32
    return %c0_i32, %c0_i32_0 : i32, i32
  }
  func.func @transform_4(%arg0: i32) -> (i32, i32) {
    %c0_i32 = arith.constant 0 : i32
    %c0_i32_0 = arith.constant 0 : i32
    %c0_i32_1 = arith.constant 0 : i32
    return %c0_i32, %c0_i32_0 : i32, i32
  }
  func.func @transform_5(%arg0: i32) -> (i32, i32) {
    %c0_i32 = arith.constant 0 : i32
    %c0_i32_0 = arith.constant 0 : i32
    return %arg0, %c0_i32 : i32, i32
  }
}

</mosaic_0001>

<bundles_post_ra>
// kernel: _fc_body_forward.1
= control target key start
LH: loop header
LB: loop body
LE: loop exit
PB: predicated region body
PF: predicated region fallthrough
CT: control target
= control target key end

     0   :  { %10 = vsyncpa [#allocation3], 0  ;;  %s273_s18 = smov [#allocation2]   ;;  %s332_s0 = inlined_call_operand.vmem [shape: f32[16,16], index: 0, kind: input, shape index: {}]   ;;  %s333_s1 = inlined_call_operand.vmem [shape: bf16[16,64], index: 1, kind: input, shape index: {}]   ;;  %s334_s2 = inlined_call_operand.vmem [shape: f32[1,64], index: 2, kind: input, shape index: {}]   ;;  %s335_s3 = inlined_call_operand.hbm [shape: bf16[64,64], index: 3, kind: input, shape index: {}]   ;;  %s336_s4 = inlined_call_operand.vmem [shape: f32[1,64], index: 4, kind: input, shape index: {}]   ;;  %s337_s5 = inlined_call_operand.vmem [shape: bf16[16,64], index: 5, kind: output, shape index: {}]  }
   0x1   :  { %s22_s19 = sshll.u32 %s273_s18, 4  ;;  %s23_s19 = int_to_ptr.vmem [resolvable:$true] %s22_s19 }
   0x2   :  { %s259_s20 = scalar_lea.vmem %s23_s19, 512  ;;  %p264_p1 = scmp.lt.s32.totalorder %s23_s19, %s23_s19 }
   0x3   :  { %p260_p0 = scmp.ne.s32.totalorder %s23_s19, %s259_s20  ;;  %p265_p2 = scmp.lt.s32.totalorder %s259_s20, %s259_s20 }
   0x5   :  { %p266_p3 = por %p265_p2, %p264_p1 }
   0x7   :  { %p267_p4 = pnand %p266_p3, %p260_p0 }
   0x9   :  { %270 = shalt.err (!%p267_p4)
}
   0xa   :  { %s274_s21 = smov 64   ;;  %s275_s22 = smov 4  }
   0xb   :  { %28 = dma.hbm_to_vmem [thread:$0]  %s335_s3, 512, %s23_s19, [#allocation3], %s274_s21, %s274_s21, %s275_s22  }
   0xc   :  { %271 = dma.done.wait [#allocation3], 512  }
   0xd   :  { %272 = vsyncadd [#allocation3], 4294966784  ;;  %v276_v0 = vmov 0.0   ;;  %vm277_vm0 = vmmov 0   ;;  %v246_v1 = vld [vmem:[%s333_s1] sm:$0xff]   ;;  %v36_v3 = vld [vmem:[%s332_s0 + $0x8] sm:$0xff] }
   0xe   :  { %223 = vmatprep.subr.bf16.mxu0 %v276_v0  ;;  %225 = vmatprep.mubr.msk.bf16.mxu0 %vm277_vm0, %v276_v0  ;;  %v35_v2 = vld [vmem:[%s332_s0] sm:$0xff]  ;;  %vm53_vm1 = vcmask 130048   ;;  %v247_v5 = vld [vmem:[#allocation2 + $0x18] sm:$0xff]   ;;  %v248_v6 = vld [vmem:[#allocation2 + $0x10] sm:$0xff]   ;;  %vm140_vm2 = vcmask 523264   ;;  %vm195_vm3 = vcmask 519168  }
   0xf   :  { %229 = vmatprep.subr.bf16.mxu1 %v276_v0  ;;  %237 = vmatprep.mubr.msk.bf16.mxu1 %vm277_vm0, %v276_v0  ;;  %v37_v4 = vpack.c.bf16 %v36_v3, %v35_v2  ;;  %v249_v7 = vld [vmem:[#allocation2 + $0x8] sm:$0xff]   ;;  %v250_v8 = vld [vmem:[#allocation2] sm:$0xff]  }
  0x10   :  { %224 = vmatpush3.bf16.msra.mxu0 %v246_v1  ;;  %230 = vmatpush3.bf16.msra.mxu1 %v247_v5  ;;  %v203_v9 = vld [vmem:[%s334_s2] ss:$0 sm:$0xff] }
  0x11   :  { %231 = vmatprep.subr.bf16.mxu1 %v276_v0  ;;  %v206_v19 = vld [vmem:[%s336_s4] ss:$0 sm:$0xff] }
  0x13   :  { %226 = vmatmul.mubr.msk.bf16.vlgmr.msra.gmra.mxu0 %vm53_vm1, %v37_v4 }
  0x14   :  { %232 = vmatpush3.bf16.msra.mxu1 %v248_v6 }
  0x15   :  { %233 = vmatprep.subr.bf16.mxu1 %v276_v0 }
  0x18   :  { %234 = vmatpush3.bf16.msra.mxu1 %v249_v7 }
  0x19   :  { %235 = vmatprep.subr.bf16.mxu1 %v276_v0 }
  0x1c   :  { %236 = vmatpush3.bf16.msra.mxu1 %v250_v8 }
  0xd3   :  { %v91_v10 = vpop.f32.mrf.mxu0 }
  0xd4   :  { %v92_v12 = vadd.f32 %v203_v9, %v91_v10 }
  0xd5   :  { %v227_v11 = vpop.f32.mrf.mxu0 }
  0xd6   :  { %v98_v16 = vmax.f32 %v92_v12, 0.0 }
  0xd7   :  { %v94_v13 = vpop.f32.mrf.mxu0 }
  0xd8   :  { %v95_v14 = vadd.f32 %v203_v9, %v94_v13 }
  0xd9   :  { %v228_v15 = vpop.f32.mrf.mxu0 }
  0xda   :  { %v99_v17 = vmax.f32 %v95_v14, 0.0 }
  0xdc   :  { %v100_v18 = vpack.c.bf16 %v99_v17, %v98_v16 }
  0xde   :  { %238 = vmatmul.mubr.msk.bf16.vlgmr.msra.gmra.mxu1 %vm140_vm2, %v100_v18 }
 0x19e   :  { %v178_v20 = vpop.f32.mrf.mxu1 }
 0x19f   :  { %v179_v21 = vadd.f32 %v206_v19, %v178_v20 }
 0x1a0   :  { %v239_v22 = vpop.f32.mrf.mxu1 }
 0x1a1   :  { %v185_v23 = vmax.f32 %v179_v21, 0.0 }
 0x1a2   :  { %v181_v24 = vpop.f32.mrf.mxu1 }
 0x1a3   :  { %v214_v25 = vpack.c.bf16 %v185_v23, %v185_v23  ;;  %v182_v26 = vadd.f32 %v206_v19, %v181_v24 }
 0x1a4   :  { %v240_v27 = vpop.f32.mrf.mxu1 }
 0x1a5   :  { %196 = vst.msk [vmem:[%s337_s5] sm:$0xf] %vm195_vm3, %v214_v25  ;;  %v186_v28 = vmax.f32 %v182_v26, 0.0 }
 0x1a7   :  { %v215_v29 = vpack.c.bf16 %v186_v28, %v186_v28 }
 0x1a9   :  { %197 = vst.msk [vmem:[%s337_s5 + $0x4] sm:$0xf] %vm195_vm3, %v215_v29 }
 0x1aa   :  { %202 = vsyncpa [#allocation3], 1 }

</bundles_post_ra>
